<compile_context>
chip_gen: v5e
topology: v5e:2x2
jax: 0.10.0
libtpu: 0.0.40
codegen_flags: <defaults>
</compile_context>

<pallas_src>
import jax
import jax.numpy as jnp
from jax.experimental import pallas as pl
from jax.experimental.pallas import tpu as pltpu

K_IN = 100     # latent dim
H = 128        # fc1 width
N_OUT = 784    # fc2 width (28*28) -- used directly as the output lane extent
K_PAD = 128    # padded contraction dim for fc1 (zero padding is exact)


def generator_kernel(x_ref, w1_ref, b1_ref, w2_ref, b2_ref, o_ref):
    # fc1 + relu  (MXU matmul, f32 accumulation; zero-padded K is exact)
    h = jnp.dot(x_ref[...], w1_ref[...], preferred_element_type=jnp.float32)
    h = jnp.maximum(h + b1_ref[...], 0.0)
    # fc2 + tanh  (full 784-wide output tile; last 16-lane sub-tile is a masked vst)
    y = jnp.dot(h, w2_ref[...], preferred_element_type=jnp.float32)
    o_ref[...] = jnp.tanh(y + b2_ref[...])


def _round_up(x, m):
    return ((x + m - 1) // m) * m


def _vmem_limit_bytes(tm):
    """Tile footprint estimate (+ headroom) for an explicit scoped-VMEM limit."""
    f32 = 4
    x_blk = tm * K_PAD * f32
    out_blk = tm * N_OUT * f32
    weights = (K_PAD * H + 8 * H + H * N_OUT + 8 * N_OUT) * f32   # w1, b1, w2, b2 (padded rows)
    h_tmp = tm * H * f32
    est = 2 * (x_blk + out_blk) + 2 * weights + h_tmp + (x_blk + out_blk)  # dbl-buffer + temps
    return int(min(max(est + (4 << 20), 16 << 20), 32 << 20))


def generator_forward(x, w1, b1, w2, b2, *, block_m=1024):
    """x: (B, 100) f32 -> (B, 1, 28, 28) f32.

    Weights are stored PyTorch-logically transposed: w1 (100,128), w2 (128,784),
    biases (1,128)/(1,784)."""
    B = x.shape[0]

    # --- batch tiling: big tiles for HBM roofline, but guarantee >=2 grid steps
    #     (so v7x megacore shards the batch axis) whenever B allows it. ---
    tm = _round_up(min(block_m, _round_up(B, 8)), 8)
    while tm > 8 and pl.cdiv(_round_up(B, 8), tm) < 2:
        tm = _round_up(tm // 2, 8)
    b_pad = _round_up(B, tm)
    grid = (b_pad // tm,)

    # --- single fused pad of x: contraction dim 100->128 and batch B->b_pad ---
    x_p = jnp.pad(x, ((0, b_pad - B), (0, K_PAD - K_IN)))        # (b_pad, 128)
    w1_p = jnp.pad(w1, ((0, K_PAD - K_IN), (0, 0)))              # (128, 128)

    cost = pl.CostEstimate(
        flops=2 * b_pad * (K_PAD * H + H * N_OUT),
        transcendentals=b_pad * N_OUT,                           # tanh
        bytes_accessed=4 * (b_pad * K_PAD + K_PAD * H + H
                            + H * N_OUT + N_OUT + b_pad * N_OUT),
    )

    out_flat = pl.pallas_call(
        generator_kernel,
        out_shape=jax.ShapeDtypeStruct((b_pad, N_OUT), jnp.float32),
        grid_spec=pltpu.PrefetchScalarGridSpec(
            num_scalar_prefetch=0,
            grid=grid,
            in_specs=[
                pl.BlockSpec((tm, K_PAD), lambda i: (i, 0)),     # x tile
                pl.BlockSpec((K_PAD, H), lambda i: (0, 0)),      # w1 (resident)
                pl.BlockSpec((1, H), lambda i: (0, 0)),          # b1 (resident)
                pl.BlockSpec((H, N_OUT), lambda i: (0, 0)),      # w2 (resident)
                pl.BlockSpec((1, N_OUT), lambda i: (0, 0)),      # b2 (resident)
            ],
            out_specs=pl.BlockSpec((tm, N_OUT), lambda i: (i, 0)),
        ),
        compiler_params=pltpu.CompilerParams(
            dimension_semantics=("parallel",),        # batch tiles are independent
            vmem_limit_bytes=_vmem_limit_bytes(tm),   # portable to v5e's 16 MiB default
        ),
        cost_estimate=cost,
    )(x_p, w1_p, b1, w2, b2)

    # Glue: drop batch padding (if any), reshape flat pixels to NCHW (B, 1, 28, 28).
    if b_pad != B:
        out_flat = out_flat[:B]
    return out_flat.reshape(B, 1, 28, 28)


def init_params(key):
    """Deterministic init mimicking nn.Linear default (U(-1/sqrt(fan_in), +1/sqrt(fan_in))).

    Stored pre-transposed: (in_features, out_features)."""
    k1, k2, k3, k4 = jax.random.split(key, 4)
    bound1 = 1.0 / jnp.sqrt(100.0)
    bound2 = 1.0 / jnp.sqrt(128.0)
    w1 = jax.random.uniform(k1, (K_IN, H), jnp.float32, -bound1, bound1)
    b1 = jax.random.uniform(k2, (1, H), jnp.float32, -bound1, bound1)
    w2 = jax.random.uniform(k3, (H, N_OUT), jnp.float32, -bound2, bound2)
    b2 = jax.random.uniform(k4, (1, N_OUT), jnp.float32, -bound2, bound2)
    return w1, b1, w2, b2


if __name__ == "__main__":
    key = jax.random.PRNGKey(0)
    kx, kp = jax.random.split(key)

    B = 8  # small demo batch (tm collapses to 8; large batches use 512-1024 row tiles)
    x = jax.random.normal(kx, (B, K_IN), jnp.float32)  # latent vectors
    w1, b1, w2, b2 = init_params(kp)

    fwd = jax.jit(generator_forward)
    out = fwd(x, w1, b1, w2, b2)
    out = jax.block_until_ready(out)

    # Sanity check against plain-JAX reference
    ref = jnp.tanh(jnp.maximum(x @ w1 + b1, 0.0) @ w2 + b2).reshape(B, 1, 28, 28)
    assert out.shape == (B, 1, 28, 28)
    assert jnp.allclose(out, ref, atol=1e-5, rtol=1e-5)

    print("KERNEL_OK")
</pallas_src>

<mosaic_0001>
module attributes {stable_mosaic.version = 11 : i64} {
  func.func @generator_kernel(%arg0: i32, %arg1: memref<8x128xf32, #tpu.memory_space<vmem>>, %arg2: memref<128x128xf32, #tpu.memory_space<vmem>>, %arg3: memref<1x128xf32, #tpu.memory_space<vmem>>, %arg4: memref<128x784xf32, #tpu.memory_space<vmem>>, %arg5: memref<1x784xf32, #tpu.memory_space<vmem>>, %arg6: memref<8x784xf32, #tpu.memory_space<vmem>>) attributes {dimension_semantics = [#tpu.dimension_semantics<parallel>], iteration_bounds = array<i64: 1>, scalar_prefetch = 0 : i64, scratch_operands = 0 : i64, tpu.core_type = #tpu.core_type<tc>, window_params = [{transform_indices = @transform_0, window_bounds = array<i64: 8, 128>}, {pipeline_mode = #tpu.pipeline_mode<synchronous>, transform_indices = @transform_1, window_bounds = array<i64: 128, 128>}, {pipeline_mode = #tpu.pipeline_mode<synchronous>, transform_indices = @transform_2, window_bounds = array<i64: 1, 128>}, {pipeline_mode = #tpu.pipeline_mode<synchronous>, transform_indices = @transform_3, window_bounds = array<i64: 128, 784>}, {pipeline_mode = #tpu.pipeline_mode<synchronous>, transform_indices = @transform_4, window_bounds = array<i64: 1, 784>}, {transform_indices = @transform_5, window_bounds = array<i64: 8, 784>}]} {
    %c0 = arith.constant 0 : index
    %c0_0 = arith.constant 0 : index
    %0 = vector.load %arg1[%c0, %c0_0] : memref<8x128xf32, #tpu.memory_space<vmem>>, vector<8x128xf32>
    %c0_1 = arith.constant 0 : index
    %c0_2 = arith.constant 0 : index
    %1 = vector.load %arg2[%c0_1, %c0_2] : memref<128x128xf32, #tpu.memory_space<vmem>>, vector<128x128xf32>
    %cst = arith.constant dense<0.000000e+00> : vector<8x128xf32>
    %2 = tpu.matmul %0, %1, %cst {dimension_numbers = #tpu.dot_dimension_numbers<[1], [0], [0], [1], [0, 0, 1, 1], [], []>} : vector<8x128xf32>, vector<128x128xf32>, vector<8x128xf32> -> vector<8x128xf32>
    %c0_3 = arith.constant 0 : index
    %c0_4 = arith.constant 0 : index
    %3 = vector.load %arg3[%c0_3, %c0_4] : memref<1x128xf32, #tpu.memory_space<vmem>>, vector<1x128xf32>
    %4 = vector.broadcast %3 : vector<1x128xf32> to vector<8x128xf32>
    %5 = arith.addf %2, %4 : vector<8x128xf32>
    %cst_5 = arith.constant 0.000000e+00 : f32
    %6 = vector.broadcast %cst_5 : f32 to vector<8x128xf32>
    %7 = arith.maximumf %5, %6 : vector<8x128xf32>
    %c0_6 = arith.constant 0 : index
    %c0_7 = arith.constant 0 : index
    %8 = vector.load %arg4[%c0_6, %c0_7] : memref<128x784xf32, #tpu.memory_space<vmem>>, vector<128x784xf32>
    %cst_8 = arith.constant dense<0.000000e+00> : vector<8x784xf32>
    %9 = tpu.matmul %7, %8, %cst_8 {dimension_numbers = #tpu.dot_dimension_numbers<[1], [0], [0], [1], [0, 0, 1, 1], [], []>} : vector<8x128xf32>, vector<128x784xf32>, vector<8x784xf32> -> vector<8x784xf32>
    %c0_9 = arith.constant 0 : index
    %c0_10 = arith.constant 0 : index
    %10 = vector.load %arg5[%c0_9, %c0_10] : memref<1x784xf32, #tpu.memory_space<vmem>>, vector<1x784xf32>
    %11 = vector.broadcast %10 : vector<1x784xf32> to vector<8x784xf32>
    %12 = arith.addf %9, %11 : vector<8x784xf32>
    %13 = math.tanh %12 : vector<8x784xf32>
    %c0_11 = arith.constant 0 : index
    %c0_12 = arith.constant 0 : index
    %14 = vector.load %arg6[%c0_11, %c0_12] : memref<8x784xf32, #tpu.memory_space<vmem>>, vector<8x784xf32>
    tpu.vector_store %arg6[%c0_11, %c0_12], %13 {strides = array<i32>} : memref<8x784xf32, #tpu.memory_space<vmem>>, vector<8x784xf32>,
    return
  }
  func.func @transform_0(%arg0: i32) -> (i32, i32) {
    %c0_i32 = arith.constant 0 : i32
    %c0_i32_0 = arith.constant 0 : i32
    return %arg0, %c0_i32 : i32, i32
  }
  func.func @transform_1(%arg0: i32) -> (i32, i32) {
    %c0_i32 = arith.constant 0 : i32
    %c0_i32_0 = arith.constant 0 : i32
    %c0_i32_1 = arith.constant 0 : i32
    return %c0_i32, %c0_i32_0 : i32, i32
  }
  func.func @transform_2(%arg0: i32) -> (i32, i32) {
    %c0_i32 = arith.constant 0 : i32
    %c0_i32_0 = arith.constant 0 : i32
    %c0_i32_1 = arith.constant 0 : i32
    return %c0_i32, %c0_i32_0 : i32, i32
  }
  func.func @transform_3(%arg0: i32) -> (i32, i32) {
    %c0_i32 = arith.constant 0 : i32
    %c0_i32_0 = arith.constant 0 : i32
    %c0_i32_1 = arith.constant 0 : i32
    return %c0_i32, %c0_i32_0 : i32, i32
  }
  func.func @transform_4(%arg0: i32) -> (i32, i32) {
    %c0_i32 = arith.constant 0 : i32
    %c0_i32_0 = arith.constant 0 : i32
    %c0_i32_1 = arith.constant 0 : i32
    return %c0_i32, %c0_i32_0 : i32, i32
  }
  func.func @transform_5(%arg0: i32) -> (i32, i32) {
    %c0_i32 = arith.constant 0 : i32
    %c0_i32_0 = arith.constant 0 : i32
    return %arg0, %c0_i32 : i32, i32
  }
}

</mosaic_0001>

<bundles_post_ra>
// kernel: generator_forward.1
= control target key start
LH: loop header
LB: loop body
LE: loop exit
PB: predicated region body
PF: predicated region fallthrough
CT: control target
= control target key end

     0   :  { %vm343_vm0 = vcmask 130048   ;;  %s808_s1 = inlined_call_operand.vmem [shape: f32[128,128], index: 1, kind: input, shape index: {}]   ;;  %s809_s3 = inlined_call_operand.vmem [shape: f32[128,784], index: 3, kind: input, shape index: {}]   ;;  %s810_s0 = inlined_call_operand.vmem [shape: f32[8,128], index: 0, kind: input, shape index: {}]   ;;  %s811_s2 = inlined_call_operand.vmem [shape: f32[1,128], index: 2, kind: input, shape index: {}]   ;;  %s812_s4 = inlined_call_operand.vmem [shape: f32[1,784], index: 4, kind: input, shape index: {}]   ;;  %s813_s5 = inlined_call_operand.vmem [shape: f32[8,784], index: 5, kind: output, shape index: {}]  }
   0x1   :  { %v36_v0 = vld [vmem:[%s808_s1 + $0x78] sm:$0xff]  ;;  %v35_v1 = vld [vmem:[%s808_s1 + $0x70] sm:$0xff]  ;;  %v34_v2 = vld [vmem:[%s808_s1 + $0x68] sm:$0xff] }
   0x2   :  { %41 = vmatpush.msra.mxu0 %v36_v0  ;;  %v33_v3 = vld [vmem:[%s808_s1 + $0x60] sm:$0xff]  ;;  %v32_v4 = vld [vmem:[%s808_s1 + $0x58] sm:$0xff]  ;;  %v167_v5 = vld [vmem:[%s809_s3 + $0x348] sm:$0xff] }
   0x3   :  { %190 = vmatpush.msra.mxu1 %v167_v5  ;;  %v168_v6 = vld [vmem:[%s809_s3 + $0x350] sm:$0xff]  ;;  %v169_v7 = vld [vmem:[%s809_s3 + $0x358] sm:$0xff]  ;;  %v162_v10 = vld [vmem:[%s809_s3 + $0x320] sm:$0xff] }
   0x4   :  { %42 = vmatpush.msra.mxu0 %v35_v1  ;;  %v160_v8 = vld [vmem:[%s809_s3 + $0x310] sm:$0xff]  ;;  %210 = vmatpush.msra.mxu2 %v168_v6  ;;  %v161_v9 = vld [vmem:[%s809_s3 + $0x318] sm:$0xff]  ;;  %v154_v13 = vld [vmem:[%s809_s3 + $0x2e0] sm:$0xff] }
   0x5   :  { %v153_v11 = vld [vmem:[%s809_s3 + $0x2d8] sm:$0xff]  ;;  %v31_v12 = vld [vmem:[%s808_s1 + $0x50] sm:$0xff]  ;;  %230 = vmatpush.msra.mxu3 %v169_v7  ;;  %191 = vmatpush.msra.mxu1 %v160_v8  ;;  %v155_v14 = vld [vmem:[%s809_s3 + $0x2e8] sm:$0xff] }
   0x6   :  { %43 = vmatpush.msra.mxu0 %v34_v2  ;;  %211 = vmatpush.msra.mxu2 %v161_v9  ;;  %v146_v15 = vld [vmem:[%s809_s3 + $0x2a0] sm:$0xff]  ;;  %v30_v16 = vld [vmem:[%s808_s1 + $0x48] sm:$0xff]  ;;  %v148_v18 = vld [vmem:[%s809_s3 + $0x2b0] sm:$0xff] }
   0x7   :  { %231 = vmatpush.msra.mxu3 %v162_v10  ;;  %192 = vmatpush.msra.mxu1 %v153_v11  ;;  %v147_v17 = vld [vmem:[%s809_s3 + $0x2a8] sm:$0xff]  ;;  %v29_v20 = vld [vmem:[%s808_s1 + $0x40] sm:$0xff]  ;;  %v140_v21 = vld [vmem:[%s809_s3 + $0x270] sm:$0xff] }
   0x8   :  { %44 = vmatpush.msra.mxu0 %v33_v3  ;;  %212 = vmatpush.msra.mxu2 %v154_v13  ;;  %v139_v19 = vld [vmem:[%s809_s3 + $0x268] sm:$0xff]  ;;  %v141_v22 = vld [vmem:[%s809_s3 + $0x278] sm:$0xff]  ;;  %v132_v23 = vld [vmem:[%s809_s3 + $0x230] sm:$0xff] }
   0x9   :  { %232 = vmatpush.msra.mxu3 %v155_v14  ;;  %193 = vmatpush.msra.mxu1 %v146_v15  ;;  %v28_v24 = vld [vmem:[%s808_s1 + $0x38] sm:$0xff]  ;;  %v134_v26 = vld [vmem:[%s809_s3 + $0x240] sm:$0xff]  ;;  %v27_v28 = vld [vmem:[%s808_s1 + $0x30] sm:$0xff] }
   0xa   :  { %45 = vmatpush.msra.mxu0 %v32_v4  ;;  %213 = vmatpush.msra.mxu2 %v147_v17  ;;  %v133_v25 = vld [vmem:[%s809_s3 + $0x238] sm:$0xff]  ;;  %v126_v29 = vld [vmem:[%s809_s3 + $0x200] sm:$0xff]  ;;  %v127_v30 = vld [vmem:[%s809_s3 + $0x208] sm:$0xff] }
   0xb   :  { %233 = vmatpush.msra.mxu3 %v148_v18  ;;  %194 = vmatpush.msra.mxu1 %v139_v19  ;;  %v125_v27 = vld [vmem:[%s809_s3 + $0x1f8] sm:$0xff]  ;;  %v118_v31 = vld [vmem:[%s809_s3 + $0x1c0] sm:$0xff]  ;;  %v26_v32 = vld [vmem:[%s808_s1 + $0x28] sm:$0xff] }
   0xc   :  { %46 = vmatpush.msra.mxu0 %v31_v12  ;;  %214 = vmatpush.msra.mxu2 %v140_v21  ;;  %v119_v33 = vld [vmem:[%s809_s3 + $0x1c8] sm:$0xff]  ;;  %v120_v34 = vld [vmem:[%s809_s3 + $0x1d0] sm:$0xff]  ;;  %v25_v36 = vld [vmem:[%s808_s1 + $0x20] sm:$0xff] }
   0xd   :  { %234 = vmatpush.msra.mxu3 %v141_v22  ;;  %195 = vmatpush.msra.mxu1 %v132_v23  ;;  %v111_v35 = vld [vmem:[%s809_s3 + $0x188] sm:$0xff]  ;;  %v112_v37 = vld [vmem:[%s809_s3 + $0x190] sm:$0xff]  ;;  %v113_v38 = vld [vmem:[%s809_s3 + $0x198] sm:$0xff] }
   0xe   :  { %47 = vmatpush.msra.mxu0 %v30_v16  ;;  %215 = vmatpush.msra.mxu2 %v133_v25  ;;  %v104_v39 = vld [vmem:[%s809_s3 + $0x150] sm:$0xff]  ;;  %v24_v40 = vld [vmem:[%s808_s1 + $0x18] sm:$0xff]  ;;  %v106_v42 = vld [vmem:[%s809_s3 + $0x160] sm:$0xff] }
   0xf   :  { %235 = vmatpush.msra.mxu3 %v134_v26  ;;  %196 = vmatpush.msra.mxu1 %v125_v27  ;;  %v105_v41 = vld [vmem:[%s809_s3 + $0x158] sm:$0xff]  ;;  %v23_v44 = vld [vmem:[%s808_s1 + $0x10] sm:$0xff]  ;;  %v98_v45 = vld [vmem:[%s809_s3 + $0x120] sm:$0xff] }
  0x10   :  { %48 = vmatpush.msra.mxu0 %v29_v20  ;;  %216 = vmatpush.msra.mxu2 %v126_v29  ;;  %v97_v43 = vld [vmem:[%s809_s3 + $0x118] sm:$0xff]  ;;  %v99_v46 = vld [vmem:[%s809_s3 + $0x128] sm:$0xff]  ;;  %v90_v47 = vld [vmem:[%s809_s3 + $0xe0] sm:$0xff] }
  0x11   :  { %236 = vmatpush.msra.mxu3 %v127_v30  ;;  %197 = vmatpush.msra.mxu1 %v118_v31  ;;  %v22_v48 = vld [vmem:[%s808_s1 + $0x8] sm:$0xff]  ;;  %v92_v50 = vld [vmem:[%s809_s3 + $0xf0] sm:$0xff]  ;;  %v21_v52 = vld [vmem:[%s808_s1] sm:$0xff] }
  0x12   :  { %49 = vmatpush.msra.mxu0 %v28_v24  ;;  %217 = vmatpush.msra.mxu2 %v119_v33  ;;  %v91_v49 = vld [vmem:[%s809_s3 + $0xe8] sm:$0xff]  ;;  %v84_v53 = vld [vmem:[%s809_s3 + $0xb0] sm:$0xff]  ;;  %v20_v54 = vld [vmem:[%s810_s0] sm:$0xff] }
  0x13   :  { %237 = vmatpush.msra.mxu3 %v120_v34  ;;  %198 = vmatpush.msra.mxu1 %v111_v35  ;;  %v83_v51 = vld [vmem:[%s809_s3 + $0xa8] sm:$0xff]  ;;  %v85_v55 = vld [vmem:[%s809_s3 + $0xb8] sm:$0xff]  ;;  %v170_v56 = vld [vmem:[%s809_s3 + $0x360] sm:$0xff] }
  0x14   :  { %50 = vmatpush.msra.mxu0 %v27_v28  ;;  %218 = vmatpush.msra.mxu2 %v112_v37  ;;  %v76_v57 = vld [vmem:[%s809_s3 + $0x70] sm:$0xff]  ;;  %v77_v58 = vld [vmem:[%s809_s3 + $0x78] sm:$0xff]  ;;  %v78_v59 = vld [vmem:[%s809_s3 + $0x80] sm:$0xff] }
  0x15   :  { %238 = vmatpush.msra.mxu3 %v113_v38  ;;  %199 = vmatpush.msra.mxu1 %v104_v39  ;;  %v163_v60 = vld [vmem:[%s809_s3 + $0x328] sm:$0xff]  ;;  %v69_v61 = vld [vmem:[%s809_s3 + $0x38] sm:$0xff]  ;;  %v70_v62 = vld [vmem:[%s809_s3 + $0x40] sm:$0xff] }
  0x16   :  { %51 = vmatpush.msra.mxu0 %v26_v32  ;;  %219 = vmatpush.msra.mxu2 %v105_v41  ;;  %v71_v63 = vld [vmem:[%s809_s3 + $0x48] sm:$0xff]  ;;  %v156_v0 = vld [vmem:[%s809_s3 + $0x2f0] sm:$0xff]  ;;  %v62_v1 = vld [vmem:[%s809_s3] sm:$0xff] }
  0x17   :  { %239 = vmatpush.msra.mxu3 %v106_v42  ;;  %200 = vmatpush.msra.mxu1 %v97_v43  ;;  %v63_v2 = vld [vmem:[%s809_s3 + $0x8] sm:$0xff]  ;;  %v64_v3 = vld [vmem:[%s809_s3 + $0x10] sm:$0xff]  ;;  %v149_v4 = vld [vmem:[%s809_s3 + $0x2b8] sm:$0xff] }
  0x18   :  { %52 = vmatpush.msra.mxu0 %v25_v36  ;;  %220 = vmatpush.msra.mxu2 %v98_v45  ;;  %v171_v5 = vld [vmem:[%s809_s3 + $0x368] sm:$0xff]  ;;  %v172_v6 = vld [vmem:[%s809_s3 + $0x370] sm:$0xff]  ;;  %v173_v7 = vld [vmem:[%s809_s3 + $0x378] sm:$0xff] }
  0x19   :  { %240 = vmatpush.msra.mxu3 %v99_v46  ;;  %201 = vmatpush.msra.mxu1 %v90_v47  ;;  %v142_v8 = vld [vmem:[%s809_s3 + $0x280] sm:$0xff]  ;;  %v164_v9 = vld [vmem:[%s809_s3 + $0x330] sm:$0xff]  ;;  %v165_v10 = vld [vmem:[%s809_s3 + $0x338] sm:$0xff] }
  0x1a   :  { %53 = vmatpush.msra.mxu0 %v24_v40  ;;  %221 = vmatpush.msra.mxu2 %v91_v49  ;;  %v166_v11 = vld [vmem:[%s809_s3 + $0x340] sm:$0xff]  ;;  %v135_v12 = vld [vmem:[%s809_s3 + $0x248] sm:$0xff]  ;;  %v157_v13 = vld [vmem:[%s809_s3 + $0x2f8] sm:$0xff] }
  0x1b   :  { %241 = vmatpush.msra.mxu3 %v92_v50  ;;  %202 = vmatpush.msra.mxu1 %v83_v51  ;;  %v158_v14 = vld [vmem:[%s809_s3 + $0x300] sm:$0xff]  ;;  %v159_v15 = vld [vmem:[%s809_s3 + $0x308] sm:$0xff]  ;;  %v128_v16 = vld [vmem:[%s809_s3 + $0x210] sm:$0xff] }
  0x1c   :  { %54 = vmatpush.msra.mxu0 %v23_v44  ;;  %222 = vmatpush.msra.mxu2 %v84_v53  ;;  %v150_v17 = vld [vmem:[%s809_s3 + $0x2c0] sm:$0xff]  ;;  %v151_v18 = vld [vmem:[%s809_s3 + $0x2c8] sm:$0xff]  ;;  %v152_v19 = vld [vmem:[%s809_s3 + $0x2d0] sm:$0xff] }
  0x1d   :  { %242 = vmatpush.msra.mxu3 %v85_v55  ;;  %203 = vmatpush.msra.mxu1 %v76_v57  ;;  %v121_v20 = vld [vmem:[%s809_s3 + $0x1d8] sm:$0xff]  ;;  %v143_v21 = vld [vmem:[%s809_s3 + $0x288] sm:$0xff]  ;;  %v144_v22 = vld [vmem:[%s809_s3 + $0x290] sm:$0xff] }
  0x1e   :  { %55 = vmatpush.msra.mxu0 %v22_v48  ;;  %223 = vmatpush.msra.mxu2 %v77_v58  ;;  %v145_v23 = vld [vmem:[%s809_s3 + $0x298] sm:$0xff]  ;;  %v114_v24 = vld [vmem:[%s809_s3 + $0x1a0] sm:$0xff]  ;;  %v136_v25 = vld [vmem:[%s809_s3 + $0x250] sm:$0xff] }
  0x1f   :  { %243 = vmatpush.msra.mxu3 %v78_v59  ;;  %204 = vmatpush.msra.mxu1 %v69_v61  ;;  %v137_v26 = vld [vmem:[%s809_s3 + $0x258] sm:$0xff]  ;;  %v138_v27 = vld [vmem:[%s809_s3 + $0x260] sm:$0xff]  ;;  %v107_v28 = vld [vmem:[%s809_s3 + $0x168] sm:$0xff] }
  0x20   :  { %56 = vmatpush.msra.mxu0 %v21_v52  ;;  %224 = vmatpush.msra.mxu2 %v70_v62  ;;  %v129_v29 = vld [vmem:[%s809_s3 + $0x218] sm:$0xff]  ;;  %v130_v30 = vld [vmem:[%s809_s3 + $0x220] sm:$0xff]  ;;  %v131_v31 = vld [vmem:[%s809_s3 + $0x228] sm:$0xff] }
  0x21   :  { %57 = vmatmul.f32.vlgmr.msra.gmra.mxu0 %v20_v54  ;;  %244 = vmatpush.msra.mxu3 %v71_v63  ;;  %v100_v32 = vld [vmem:[%s809_s3 + $0x130] sm:$0xff]  ;;  %v122_v33 = vld [vmem:[%s809_s3 + $0x1e0] sm:$0xff]  ;;  %v123_v34 = vld [vmem:[%s809_s3 + $0x1e8] sm:$0xff] }
  0x22   :  { %250 = vmatpush.msrb.mxu0 %v170_v56  ;;  %205 = vmatpush.msra.mxu1 %v62_v1  ;;  %v124_v35 = vld [vmem:[%s809_s3 + $0x1f0] sm:$0xff]  ;;  %v93_v36 = vld [vmem:[%s809_s3 + $0xf8] sm:$0xff]  ;;  %v115_v37 = vld [vmem:[%s809_s3 + $0x1a8] sm:$0xff] }
  0x23   :  { %225 = vmatpush.msra.mxu2 %v63_v2  ;;  %245 = vmatpush.msra.mxu3 %v64_v3  ;;  %v116_v38 = vld [vmem:[%s809_s3 + $0x1b0] sm:$0xff]  ;;  %v117_v39 = vld [vmem:[%s809_s3 + $0x1b8] sm:$0xff]  ;;  %v86_v40 = vld [vmem:[%s809_s3 + $0xc0] sm:$0xff] }
  0x24   :  { %251 = vmatpush.msrb.mxu0 %v163_v60  ;;  %270 = vmatpush.msrb.mxu1 %v171_v5  ;;  %v79_v41 = vld [vmem:[%s809_s3 + $0x88] sm:$0xff]  ;;  %v108_v42 = vld [vmem:[%s809_s3 + $0x170] sm:$0xff]  ;;  %v109_v43 = vld [vmem:[%s809_s3 + $0x178] sm:$0xff] }
  0x25   :  { %290 = vmatpush.msrb.mxu2 %v172_v6  ;;  %310 = vmatpush.msrb.mxu3 %v173_v7  ;;  %v110_v44 = vld [vmem:[%s809_s3 + $0x180] sm:$0xff]  ;;  %v72_v45 = vld [vmem:[%s809_s3 + $0x50] sm:$0xff]  ;;  %v101_v46 = vld [vmem:[%s809_s3 + $0x138] sm:$0xff] }
  0x26   :  { %252 = vmatpush.msrb.mxu0 %v156_v0  ;;  %271 = vmatpush.msrb.mxu1 %v164_v9  ;;  %v102_v47 = vld [vmem:[%s809_s3 + $0x140] sm:$0xff]  ;;  %v103_v48 = vld [vmem:[%s809_s3 + $0x148] sm:$0xff]  ;;  %v65_v49 = vld [vmem:[%s809_s3 + $0x18] sm:$0xff] }
  0x27   :  { %291 = vmatpush.msrb.mxu2 %v165_v10  ;;  %311 = vmatpush.msrb.mxu3 %v166_v11  ;;  %v94_v50 = vld [vmem:[%s809_s3 + $0x100] sm:$0xff]  ;;  %v95_v51 = vld [vmem:[%s809_s3 + $0x108] sm:$0xff]  ;;  %v96_v52 = vld [vmem:[%s809_s3 + $0x110] sm:$0xff] }
  0x28   :  { %253 = vmatpush.msrb.mxu0 %v149_v4  ;;  %272 = vmatpush.msrb.mxu1 %v157_v13  ;;  %v87_v53 = vld [vmem:[%s809_s3 + $0xc8] sm:$0xff]  ;;  %v88_v54 = vld [vmem:[%s809_s3 + $0xd0] sm:$0xff]  ;;  %v89_v55 = vld [vmem:[%s809_s3 + $0xd8] sm:$0xff] }
  0x29   :  { %292 = vmatpush.msrb.mxu2 %v158_v14  ;;  %312 = vmatpush.msrb.mxu3 %v159_v15  ;;  %v80_v56 = vld [vmem:[%s809_s3 + $0x90] sm:$0xff]  ;;  %v81_v57 = vld [vmem:[%s809_s3 + $0x98] sm:$0xff]  ;;  %v82_v58 = vld [vmem:[%s809_s3 + $0xa0] sm:$0xff] }
  0x2a   :  { %254 = vmatpush.msrb.mxu0 %v142_v8  ;;  %273 = vmatpush.msrb.mxu1 %v150_v17  ;;  %v73_v59 = vld [vmem:[%s809_s3 + $0x58] sm:$0xff]  ;;  %v74_v60 = vld [vmem:[%s809_s3 + $0x60] sm:$0xff]  ;;  %v75_v61 = vld [vmem:[%s809_s3 + $0x68] sm:$0xff] }
  0x2b   :  { %293 = vmatpush.msrb.mxu2 %v151_v18  ;;  %313 = vmatpush.msrb.mxu3 %v152_v19  ;;  %v66_v62 = vld [vmem:[%s809_s3 + $0x20] sm:$0xff]  ;;  %v67_v63 = vld [vmem:[%s809_s3 + $0x28] sm:$0xff]  ;;  %v68_v0 = vld [vmem:[%s809_s3 + $0x30] sm:$0xff] }
  0x2c   :  { %255 = vmatpush.msrb.mxu0 %v135_v12  ;;  %274 = vmatpush.msrb.mxu1 %v143_v21  ;;  %v349_v1 = vld [vmem:[%s811_s2] ss:$0 sm:$0xff] }
  0x2d   :  { %294 = vmatpush.msrb.mxu2 %v144_v22  ;;  %314 = vmatpush.msrb.mxu3 %v145_v23  ;;  %v174_v5 = vld [vmem:[%s812_s4] sm:$0x7f] }
  0x2e   :  { %256 = vmatpush.msrb.mxu0 %v128_v16  ;;  %275 = vmatpush.msrb.mxu1 %v136_v25  ;;  %v176_v6 = vperm.slane %v174_v5, 0  ;;  %v179_v7 = vperm.slane %v174_v5, 3  ;;  %v177_v12 = vperm.slane %v174_v5, 1  ;;  %v178_v13 = vperm.slane %v174_v5, 2 }
  0x2f   :  { %295 = vmatpush.msrb.mxu2 %v137_v26  ;;  %315 = vmatpush.msrb.mxu3 %v138_v27  ;;  %v180_v14 = vperm.slane %v174_v5, 4  ;;  %v181_v23 = vperm.slane %v174_v5, 5 }
  0x30   :  { %257 = vmatpush.msrb.mxu0 %v121_v20  ;;  %276 = vmatpush.msrb.mxu1 %v129_v29 }
  0x31   :  { %296 = vmatpush.msrb.mxu2 %v130_v30  ;;  %316 = vmatpush.msrb.mxu3 %v131_v31 }
  0x32   :  { %258 = vmatpush.msrb.mxu0 %v114_v24  ;;  %277 = vmatpush.msrb.mxu1 %v122_v33  ;;  %v182_v24 = vperm.slane %v174_v5, 6 }
  0x33   :  { %297 = vmatpush.msrb.mxu2 %v123_v34  ;;  %317 = vmatpush.msrb.mxu3 %v124_v35 }
  0x34   :  { %259 = vmatpush.msrb.mxu0 %v107_v28  ;;  %278 = vmatpush.msrb.mxu1 %v115_v37 }
  0x35   :  { %298 = vmatpush.msrb.mxu2 %v116_v38  ;;  %318 = vmatpush.msrb.mxu3 %v117_v39 }
  0x36   :  { %260 = vmatpush.msrb.mxu0 %v100_v32  ;;  %279 = vmatpush.msrb.mxu1 %v108_v42 }
  0x37   :  { %299 = vmatpush.msrb.mxu2 %v109_v43  ;;  %319 = vmatpush.msrb.mxu3 %v110_v44 }
  0x38   :  { %261 = vmatpush.msrb.mxu0 %v93_v36  ;;  %280 = vmatpush.msrb.mxu1 %v101_v46 }
  0x39   :  { %300 = vmatpush.msrb.mxu2 %v102_v47  ;;  %320 = vmatpush.msrb.mxu3 %v103_v48 }
  0x3a   :  { %262 = vmatpush.msrb.mxu0 %v86_v40  ;;  %281 = vmatpush.msrb.mxu1 %v94_v50 }
  0x3b   :  { %301 = vmatpush.msrb.mxu2 %v95_v51  ;;  %321 = vmatpush.msrb.mxu3 %v96_v52 }
  0x3c   :  { %263 = vmatpush.msrb.mxu0 %v79_v41  ;;  %282 = vmatpush.msrb.mxu1 %v87_v53 }
  0x3d   :  { %302 = vmatpush.msrb.mxu2 %v88_v54  ;;  %322 = vmatpush.msrb.mxu3 %v89_v55 }
  0x3e   :  { %264 = vmatpush.msrb.mxu0 %v72_v45  ;;  %283 = vmatpush.msrb.mxu1 %v80_v56 }
  0x3f   :  { %303 = vmatpush.msrb.mxu2 %v81_v57  ;;  %323 = vmatpush.msrb.mxu3 %v82_v58 }
  0x40   :  { %265 = vmatpush.msrb.mxu0 %v65_v49  ;;  %284 = vmatpush.msrb.mxu1 %v73_v59 }
  0x41   :  { %304 = vmatpush.msrb.mxu2 %v74_v60  ;;  %324 = vmatpush.msrb.mxu3 %v75_v61 }
  0x42   :  { %285 = vmatpush.msrb.mxu1 %v66_v62 }
  0x43   :  { %305 = vmatpush.msrb.mxu2 %v67_v63  ;;  %325 = vmatpush.msrb.mxu3 %v68_v0 }
  0x9e   :  { %v58_v2 = vpop.f32.mrf.mxu0 }
  0x9f   :  { %v59_v3 = vadd.f32 %v349_v1, %v58_v2 }
  0xa1   :  { %v61_v4 = vmax.f32 %v59_v3, 0.0 }
  0xa3   :  { %206 = vmatmul.f32.vlgmr.msra.gmra.mxu1 %v61_v4  ;;  %226 = vmatmul.f32.vlgmr.msra.gmra.mxu2 %v61_v4 }
  0xa4   :  { %246 = vmatmul.f32.vlgmr.msra.gmra.mxu3 %v61_v4  ;;  %266 = vmatmul.f32.vlgmr.msrb.gmra.mxu0 %v61_v4 }
  0xab   :  { %286 = vmatmul.f32.vlgmr.msrb.gmra.mxu1 %v61_v4  ;;  %306 = vmatmul.f32.vlgmr.msrb.gmra.mxu2 %v61_v4 }
  0xac   :  { %326 = vmatmul.f32.vlgmr.msrb.gmra.mxu3 %v61_v4 }
 0x120   :  { %v207_v8 = vpop.f32.mrf.mxu1 }
 0x121   :  { %v208_v9 = vadd.f32 %v207_v8, %v176_v6  ;;  %v267_v10 = vpop.f32.mrf.mxu0 }
 0x122   :  { %v268_v11 = vadd.f32 %v267_v10, %v179_v7 }
 0x123   :  { %350 = vtanh.f32 %v208_v9 }
 0x124   :  { %352 = vtanh.f32 %v268_v11 }
 0x126   :  { %v227_v15 = vpop.f32.mrf.mxu2 }
 0x127   :  { %v228_v16 = vadd.f32 %v227_v15, %v177_v12  ;;  %v247_v17 = vpop.f32.mrf.mxu3 }
 0x128   :  { %v248_v18 = vadd.f32 %v247_v17, %v178_v13  ;;  %v287_v19 = vpop.f32.mrf.mxu1 }
 0x129   :  { %v351_v20 = vpop.eup %350  ;;  %354 = vtanh.f32 %v228_v16  ;;  %v288_v21 = vadd.f32 %v287_v19, %v180_v14 }
 0x12a   :  { %v353_v22 = vpop.eup %352  ;;  %337 = vst [vmem:[%s813_s5] sm:$0xff] %v351_v20  ;;  %356 = vtanh.f32 %v248_v18 }
 0x12b   :  { %340 = vst [vmem:[%s813_s5 + $0x18] sm:$0xff] %v353_v22  ;;  %358 = vtanh.f32 %v288_v21 }
 0x12e   :  { %v307_v25 = vpop.f32.mrf.mxu2 }
 0x12f   :  { %v355_v26 = vpop.eup %354  ;;  %v308_v27 = vadd.f32 %v307_v25, %v181_v23  ;;  %v327_v28 = vpop.f32.mrf.mxu3 }
 0x130   :  { %v357_v29 = vpop.eup %356  ;;  %338 = vst [vmem:[%s813_s5 + $0x8] sm:$0xff] %v355_v26  ;;  %v328_v30 = vadd.f32 %v327_v28, %v182_v24 }
 0x131   :  { %v359_v31 = vpop.eup %358  ;;  %339 = vst [vmem:[%s813_s5 + $0x10] sm:$0xff] %v357_v29  ;;  %360 = vtanh.f32 %v308_v27 }
 0x132   :  { %341 = vst [vmem:[%s813_s5 + $0x20] sm:$0xff] %v359_v31  ;;  %362 = vtanh.f32 %v328_v30 }
 0x137   :  { %v361_v32 = vpop.eup %360 }
 0x138   :  { %v363_v33 = vpop.eup %362  ;;  %342 = vst [vmem:[%s813_s5 + $0x28] sm:$0xff] %v361_v32 }
 0x139   :  { %344 = vst.msk [vmem:[%s813_s5 + $0x30] sm:$0xff] %vm343_vm0, %v363_v33 }

</bundles_post_ra>
